<compile_context>
chip_gen: v6e
topology: v6e:2x2x1
jax: 0.10.0
libtpu: 0.0.40
codegen_flags: <defaults>
</compile_context>

<pallas_src>
import jax
import jax.numpy as jnp
from jax import lax
from jax.experimental import pallas as pl
from jax.experimental.pallas import tpu as pltpu

EPS = 1e-5


def _layernorm_kernel(x_ref, gamma_ref, beta_ref, o_ref):
    # Per-row (per-node) LayerNorm over the feature dimension, accumulate in f32.
    x = x_ref[...].astype(jnp.float32)                       # (tile_n, D)
    mean = jnp.mean(x, axis=-1, keepdims=True)                # (tile_n, 1)
    centered = x - mean
    var = jnp.mean(centered * centered, axis=-1, keepdims=True)
    inv = lax.rsqrt(var + EPS)                                # EUP rsqrt
    y = centered * inv * gamma_ref[...] + beta_ref[...]       # affine (broadcast rows)
    o_ref[...] = y.astype(o_ref.dtype)


def _round_up(x, m):
    return ((x + m - 1) // m) * m


def _sublane_multiple(dtype):
    # Rows per fully-packed vreg sublane group: f32 -> 8, bf16 -> 16, int8/fp8 -> 32.
    return max(8, 32 // jnp.dtype(dtype).itemsize)


def _choose_tile_n(n, d, dtype, *, max_tile_rows=1024, tile_bytes_budget=8 << 20):
    """Pick a row tile: big (mem-bound roofline), sublane-aligned, VMEM-safe,
    and (when N allows) producing >= 2 grid blocks for v7x's two TensorCores."""
    sub = _sublane_multiple(dtype)
    row_bytes = max(1, d * jnp.dtype(dtype).itemsize)
    rows_by_vmem = max(sub, (tile_bytes_budget // row_bytes) // sub * sub)
    tile = min(max_tile_rows, rows_by_vmem)
    if n <= tile:
        # Small problem: split into (at most) two sublane-aligned blocks so both
        # v7x TensorCores get work; harmless on single-core v5e/v6e.
        tile = max(sub, _round_up(pl.cdiv(n, 2), sub))
    tile = min(tile, _round_up(n, sub))
    return tile


def normalization_layer(x, gamma, beta, *, tile_n=None):
    """Forward of NormalizationLayer (graph_norm=False): batch.x = LayerNorm(batch.x)."""
    n, d = x.shape
    sub = _sublane_multiple(x.dtype)
    if tile_n is None:
        tile_n = _choose_tile_n(n, d, x.dtype)
    else:
        tile_n = max(sub, _round_up(int(tile_n), sub))

    gamma2 = gamma.reshape(1, d).astype(jnp.float32)
    beta2 = beta.reshape(1, d).astype(jnp.float32)

    # VMEM budget: double-buffered x-in + out tiles, plus params and slack.
    itemsize = jnp.dtype(x.dtype).itemsize
    vmem_need = 4 * tile_n * d * itemsize + 4 * d * 4 + (1 << 20)
    vmem_limit = int(min(100 << 20, max(32 << 20, int(vmem_need * 1.5))))

    grid = (pl.cdiv(n, tile_n),)
    return pl.pallas_call(
        _layernorm_kernel,
        out_shape=jax.ShapeDtypeStruct((n, d), x.dtype),
        grid_spec=pltpu.PrefetchScalarGridSpec(
            num_scalar_prefetch=0,
            grid=grid,
            in_specs=[
                pl.BlockSpec((tile_n, d), lambda i: (i, 0)),   # x row-tile
                pl.BlockSpec((1, d), lambda i: (0, 0)),        # gamma (constant block)
                pl.BlockSpec((1, d), lambda i: (0, 0)),        # beta  (constant block)
            ],
            out_specs=pl.BlockSpec((tile_n, d), lambda i: (i, 0)),
        ),
        compiler_params=pltpu.CompilerParams(
            dimension_semantics=("parallel",),   # shards row-tiles across v7x cores
            vmem_limit_bytes=vmem_limit,
        ),
    )(x, gamma2, beta2)


def normalization_layer_ref(x, gamma, beta):
    xf = x.astype(jnp.float32)
    mean = jnp.mean(xf, axis=-1, keepdims=True)
    var = jnp.mean((xf - mean) ** 2, axis=-1, keepdims=True)
    y = (xf - mean) * lax.rsqrt(var + EPS)
    return (y * gamma[None, :].astype(jnp.float32)
            + beta[None, :].astype(jnp.float32)).astype(x.dtype)


if __name__ == "__main__":
    key = jax.random.PRNGKey(0)

    # --- f32 case: non-divisible node count, lane-dense hidden_dim ---
    num_nodes, hidden = 300, 128            # batch.x : [num_nodes, hidden_dim]
    k1, k2 = jax.random.split(key)
    x = jax.random.normal(k1, (num_nodes, hidden), dtype=jnp.float32)

    # Deterministic affine params (PyTorch default is ones/zeros; add a ramp so
    # the affine path is exercised).
    gamma = jnp.ones((hidden,), jnp.float32) + 0.01 * jnp.arange(hidden, dtype=jnp.float32)
    beta = 0.001 * jnp.arange(hidden, dtype=jnp.float32)

    out = jax.block_until_ready(normalization_layer(x, gamma, beta))
    ref = normalization_layer_ref(x, gamma, beta)
    assert out.shape == x.shape and out.dtype == x.dtype
    assert jnp.allclose(out, ref, atol=1e-5, rtol=1e-5), "f32 mismatch vs reference"

    # --- bf16 case: exercises the 16-row sublane tiling and padded tail block ---
    x_bf16 = jax.random.normal(k2, (37, hidden), dtype=jnp.float32).astype(jnp.bfloat16)
    out_bf16 = jax.block_until_ready(normalization_layer(x_bf16, gamma, beta))
    ref_bf16 = normalization_layer_ref(x_bf16, gamma, beta)
    assert out_bf16.shape == x_bf16.shape and out_bf16.dtype == jnp.bfloat16
    assert jnp.allclose(out_bf16.astype(jnp.float32), ref_bf16.astype(jnp.float32),
                        atol=2e-2, rtol=2e-2), "bf16 mismatch vs reference"

    # TODO(synk): graph_norm=True branch (GraphNorm conditioned on batch.batch
    # segment ids) is not implemented; default CKGConv config uses graph_norm=False.
    print("KERNEL_OK")
</pallas_src>

<mosaic_0001>
module attributes {stable_mosaic.version = 11 : i64} {
  func.func @_layernorm_kernel(%arg0: i32, %arg1: memref<152x128xf32, #tpu.memory_space<vmem>>, %arg2: memref<1x128xf32, #tpu.memory_space<vmem>>, %arg3: memref<1x128xf32, #tpu.memory_space<vmem>>, %arg4: memref<152x128xf32, #tpu.memory_space<vmem>>) attributes {dimension_semantics = [#tpu.dimension_semantics<parallel>], iteration_bounds = array<i64: 2>, scalar_prefetch = 0 : i64, scratch_operands = 0 : i64, tpu.core_type = #tpu.core_type<tc>, window_params = [{transform_indices = @transform_0, window_bounds = array<i64: 152, 128>}, {pipeline_mode = #tpu.pipeline_mode<synchronous>, transform_indices = @transform_1, window_bounds = array<i64: 1, 128>}, {pipeline_mode = #tpu.pipeline_mode<synchronous>, transform_indices = @transform_2, window_bounds = array<i64: 1, 128>}, {transform_indices = @transform_3, window_bounds = array<i64: 152, 128>}]} {
    %c0 = arith.constant 0 : index
    %c0_0 = arith.constant 0 : index
    %0 = vector.load %arg1[%c0, %c0_0] : memref<152x128xf32, #tpu.memory_space<vmem>>, vector<152x128xf32>
    %cst = arith.constant dense<0.000000e+00> : vector<152xf32>
    %1 = vector.multi_reduction <add>, %0, %cst [1] : vector<152x128xf32> to vector<152xf32>
    %2 = vector.shape_cast %1 : vector<152xf32> to vector<152x1xf32>
    %cst_1 = arith.constant 1.280000e+02 : f32
    %3 = vector.broadcast %cst_1 : f32 to vector<152x1xf32>
    %4 = arith.divf %2, %3 : vector<152x1xf32>
    %5 = vector.broadcast %4 : vector<152x1xf32> to vector<152x128xf32>
    %6 = arith.subf %0, %5 : vector<152x128xf32>
    %7 = arith.mulf %6, %6 : vector<152x128xf32>
    %cst_2 = arith.constant dense<0.000000e+00> : vector<152xf32>
    %8 = vector.multi_reduction <add>, %7, %cst_2 [1] : vector<152x128xf32> to vector<152xf32>
    %9 = vector.shape_cast %8 : vector<152xf32> to vector<152x1xf32>
    %cst_3 = arith.constant 1.280000e+02 : f32
    %10 = vector.broadcast %cst_3 : f32 to vector<152x1xf32>
    %11 = arith.divf %9, %10 : vector<152x1xf32>
    %cst_4 = arith.constant 9.99999974E-6 : f32
    %12 = vector.broadcast %cst_4 : f32 to vector<152x1xf32>
    %13 = arith.addf %11, %12 : vector<152x1xf32>
    %14 = math.rsqrt %13 : vector<152x1xf32>
    %15 = vector.broadcast %14 : vector<152x1xf32> to vector<152x128xf32>
    %16 = arith.mulf %6, %15 : vector<152x128xf32>
    %c0_5 = arith.constant 0 : index
    %c0_6 = arith.constant 0 : index
    %17 = vector.load %arg2[%c0_5, %c0_6] : memref<1x128xf32, #tpu.memory_space<vmem>>, vector<1x128xf32>
    %18 = vector.broadcast %17 : vector<1x128xf32> to vector<152x128xf32>
    %19 = arith.mulf %16, %18 : vector<152x128xf32>
    %c0_7 = arith.constant 0 : index
    %c0_8 = arith.constant 0 : index
    %20 = vector.load %arg3[%c0_7, %c0_8] : memref<1x128xf32, #tpu.memory_space<vmem>>, vector<1x128xf32>
    %21 = vector.broadcast %20 : vector<1x128xf32> to vector<152x128xf32>
    %22 = arith.addf %19, %21 : vector<152x128xf32>
    %c0_9 = arith.constant 0 : index
    %c0_10 = arith.constant 0 : index
    %23 = vector.load %arg4[%c0_9, %c0_10] : memref<152x128xf32, #tpu.memory_space<vmem>>, vector<152x128xf32>
    tpu.vector_store %arg4[%c0_9, %c0_10], %22 {strides = array<i32>} : memref<152x128xf32, #tpu.memory_space<vmem>>, vector<152x128xf32>,
    return
  }
  func.func @transform_0(%arg0: i32) -> (i32, i32) {
    %c0_i32 = arith.constant 0 : i32
    %c0_i32_0 = arith.constant 0 : i32
    return %arg0, %c0_i32 : i32, i32
  }
  func.func @transform_1(%arg0: i32) -> (i32, i32) {
    %c0_i32 = arith.constant 0 : i32
    %c0_i32_0 = arith.constant 0 : i32
    %c0_i32_1 = arith.constant 0 : i32
    return %c0_i32, %c0_i32_0 : i32, i32
  }
  func.func @transform_2(%arg0: i32) -> (i32, i32) {
    %c0_i32 = arith.constant 0 : i32
    %c0_i32_0 = arith.constant 0 : i32
    %c0_i32_1 = arith.constant 0 : i32
    return %c0_i32, %c0_i32_0 : i32, i32
  }
  func.func @transform_3(%arg0: i32) -> (i32, i32) {
    %c0_i32 = arith.constant 0 : i32
    %c0_i32_0 = arith.constant 0 : i32
    return %arg0, %c0_i32 : i32, i32
  }
}

</mosaic_0001>

<bundles_post_ra>
// kernel: tpu_custom_call.1
= control target key start
LH: loop header
LB: loop body
LE: loop exit
PB: predicated region body
PF: predicated region fallthrough
CT: control target
= control target key end

     0   :  { %8 = vsyncpa [#allocation3], 0  ;;  %s1178_s0 = inlined_call_operand.hbm [shape: f32[300,128], index: 0, kind: input, shape index: {}]   ;;  %s1179_s1 = inlined_call_operand.vmem [shape: f32[1,128], index: 1, kind: input, shape index: {}]   ;;  %s1180_s2 = inlined_call_operand.vmem [shape: f32[1,128], index: 2, kind: input, shape index: {}]   ;;  %s1181_s3 = inlined_call_operand.hbm [shape: f32[300,128], index: 3, kind: output, shape index: {}]  }
   0x1   :  { %10 = vsyncpa [#allocation3 + $0x1], 0 }
   0x2   :  { %11 = vsyncpa [#allocation4], 0 }
   0x3   :  { %13 = vsyncpa [#allocation4 + $0x1], 0  ;;  %s800_s12 = smov 0   ;;  %s802_s13 = smov 0  }
   0x4   :  { %s804_s14 = smov 0   ;;  %s806_s15 = smov 0  }
   0x5 LB: > { %s821_s16 = sadd.s32 4294967295, %s772_s15   ;;  %s578_s17 = sadd.s32 4294967294, %s772_s15   ;;  %s772_s15 = sphi %s806_s15, %s1195_s15   ;;  %s768_s14 = sphi %s804_s14, %s1194_s14   ;;  %s764_s13 = sphi %s802_s13, %s1193_s13   ;;  %s760_s12 = sphi %s800_s12, %s1192_s12  }
   0x6   : > { %s825_s18 = sadd.s32 1, %s772_s15   ;;  %s26_s19 = sadd.s32 1, %s768_s14 }
   0x7   : > { %s23_s20 = ssub.s32 %s772_s15, %s825_s18  ;;  %p33_p0 = scmp.ne.s32.totalorder %s768_s14, %s764_s13 }
   0x8   : > { %p24_p1 = scmp.eq.s32.totalorder %s23_s20, 0  ;;  %p34_p2 = scmp.eq.s32.totalorder %s772_s15, 0 }
   0x9   : > { %p39_p3 = scmp.ne.s32.totalorder %s764_s13, %s760_s12  ;;  %p40_p4 = scmp.eq.s32.totalorder %s821_s16, 0 }
   0xa   : > { %s837_s21 = scalar_select %p24_p1, %s768_s14, %s26_s19  }
   0xb   : > { %p35_p5 = por %p34_p2, %p33_p0  ;;  %p839_p6 = por %p40_p4, %p39_p3 }
   0xc   : > { %p105_p7 = scmp.eq.s32.totalorder %s821_s16, 1  ;;  %p111_p8 = scmp.eq.s32.totalorder %s578_s17, 1 }
   0xd   : > { %s1184_s22 = scalar_select %p839_p6, 1, 0 }
   0xe   : > { %p604_p10 = scmp.lt.s32.totalorder %s772_s15, 2  ;;  %p846_p11 = por %p105_p7, %p33_p0 }
   0xf   : > { %p850_p12 = por %p111_p8, %p39_p3  ;;  %s137_s25 = sand.u32 1, %s768_s14  }
  0x10   : > { %s1185_s23 = scalar_select %p846_p11, 1, 0 }
  0x11   : > { %s1186_s24 = scalar_select %p850_p12, 1, 0 }
  0x12   : > { %s588_s26 = smul.u32 2432, %s772_s15  ;;  %p861_p13 = pnand %p604_p10, %p35_p5 }
  0x13   : > { %s590_s27 = smul.u32 152, %s137_s25  ;;  %s867_s7 = scalar_lea.sflag [#allocation3], %s137_s25 }
  0x14   : > { %s859_s30 = scalar_lea.hbm %s1178_s0, %s588_s26  ;;  %p682_p1 = pneg %p861_p13 }
  0x15   : > { %s141_s5 = scalar_lea.vmem [#allocation2], %s590_s27  ;;  %s680_s8 = scalar_lea.hbm %s859_s30, 2432 }
  0x16   : > { %s148_s6 = sshll.u32 %s141_s5, 4  ;;  %p681_p0 = scmp.ne.s32.totalorder %s859_s30, %s680_s8  ;;  %s865_s6 = int_to_ptr.vmem [resolvable:$true] %s148_s6 }
  0x17   : > { %s685_s11 = scalar_lea.hbm %s1178_s0, 4864  ;;  %p686_p4 = scmp.lt.s32.totalorder %s859_s30, %s1178_s0 }
  0x18   : > { %p683_p2 = pnand %p682_p1, %p681_p0  ;;  %p687_p5 = scmp.lt.s32.totalorder %s685_s11, %s680_s8 }
  0x1a   : > { %p684_p3 = pneg %p683_p2  ;;  %p688_p7 = por %p687_p5, %p686_p4 }
  0x1c   : > { %p689_p8 = pnand %p688_p7, %p684_p3 }
  0x1e   : > { %692 = shalt.err (!%p689_p8)
}
  0x1f   : > { %s693_s20 = scalar_lea.vmem %s865_s6, 2432  ;;  %s774_s25 = smov [#allocation2]  }
  0x20   : > { %p694_p10 = scmp.ne.s32.totalorder %s865_s6, %s693_s20  ;;  %s698_s26 = sshll.u32 %s774_s25, 4  ;;  %s699_s26 = int_to_ptr.vmem [resolvable:$false] %s698_s26 }
  0x21   : > { %s700_s27 = scalar_lea.vmem %s699_s26, 4864  ;;  %p701_p2 = scmp.lt.s32.totalorder %s865_s6, %s699_s26 }
  0x22   : > { %p696_p9 = pnand %p694_p10, %p682_p1  ;;  %p702_p12 = scmp.lt.s32.totalorder %s700_s27, %s693_s20 }
  0x24   : > { %p697_p0 = pneg %p696_p9  ;;  %p703_p11 = por %p702_p12, %p701_p2 }
  0x26   : > { %p704_p6 = pnand %p703_p11, %p697_p0 }
  0x28   : > { %707 = shalt.err (!%p704_p6)
}
  0x29   : > { %s775_s28 = smov 128   ;;  %s776_s29 = smov 8  }
  0x2a   : > { %599 = dma.hbm_to_vmem [thread:$0]  (!%p861_p13), %s859_s30, 2432, %s865_s6, %s867_s7, %s775_s28, %s775_s28, %s776_s29  }
  0x2b   : > { %p582_p9 = scmp.ge.s32.totalorder %s772_s15, 1  ;;  %p156_p1 = scmp.lt.s32.totalorder %s772_s15, 3 }
  0x2d   : > { %p157_p3 = pnand %p582_p9, %p156_p1 }
  0x2e   : > { %s891_s5 = sand.u32 (!%p157_p3), 1, %s764_s13   ;;  %p1188_p6 = scmp.ne.s32.totalorder (!%p157_p3), %s1184_s22, 0 }
  0x2f   : > { %160 = sbr.rel (%p157_p3) target bundleno = 411 (0x19b), region = 32  ;;  %s163_s9 = scalar_lea.sflag (!%p157_p3), [#allocation3], %s891_s5 }
  0x30   : > { %s591_s8 = smul.u32 (!%p157_p3), 152, %s891_s5 }
  0x32   : > { %s897_s10 = scalar_lea.vmem (!%p157_p3), [#allocation2], %s591_s8 }
  0x34   : > { %751 = dma.done.wait (%p1188_p6), %s163_s9, 2432  }
  0x35   : > { %753 = vsyncadd (%p1188_p6), %s163_s9, 4294964864  ;;  %v191_v0 = vld [vmem:[%s897_s10] sm:$0xff]  ;;  %v193_v1 = vld [vmem:[%s897_s10 + $0x10] sm:$0xff]  ;;  %s1055_s7 = scalar_lea.vmem [#allocation5], %s591_s8  ;;  %s589_s11 = smul.u32 2432, %s821_s16 }
  0x36   : > { %210 = vadd.xlane.f32.xlu0 %v191_v0  ;;  %214 = vadd.xlane.f32.xlu1 %v193_v1  ;;  %v192_v2 = vld [vmem:[%s897_s10 + $0x8] sm:$0xff]  ;;  %v194_v3 = vld [vmem:[%s897_s10 + $0x18] sm:$0xff]  ;;  %v195_v4 = vld [vmem:[%s897_s10 + $0x20] sm:$0xff]  ;;  %s505_s17 = sshll.u32 %s1055_s7, 4  ;;  %s492_s16 = scalar_lea.sflag [#allocation4], %s891_s5  ;;  %s1132_s17 = int_to_ptr.vmem [resolvable:$true] %s505_s17 }
  0x37   : > { %v196_v5 = vld [vmem:[%s897_s10 + $0x28] sm:$0xff]  ;;  %v197_v6 = vld [vmem:[%s897_s10 + $0x30] sm:$0xff]  ;;  %v198_v7 = vld [vmem:[%s897_s10 + $0x38] sm:$0xff]  ;;  %s1130_s25 = scalar_lea.hbm %s1181_s3, %s589_s11  ;;  %s708_s26 = scalar_lea.vmem %s1132_s17, 2432 }
  0x38   : > { %v199_v8 = vld [vmem:[%s897_s10 + $0x40] sm:$0xff]  ;;  %v913_v9 = vld [vmem:[%s897_s10 + $0x48] sm:$0xff]  ;;  %v917_v10 = vld [vmem:[%s897_s10 + $0x50] sm:$0xff]  ;;  %p709_p11 = scmp.ne.s32.totalorder %s1132_s17, %s708_s26  ;;  %p1189_p12 = scmp.ne.s32.totalorder %s1185_s23, 0 }
  0x39   : > { %v920_v11 = vld [vmem:[%s897_s10 + $0x58] sm:$0xff]  ;;  %v925_v12 = vld [vmem:[%s897_s10 + $0x60] sm:$0xff]  ;;  %v928_v13 = vld [vmem:[%s897_s10 + $0x68] sm:$0xff]  ;;  %s777_s27 = smov [#allocation5]  }
  0x3a   : > { %212 = vadd.xlane.f32.xlu0 %v192_v2  ;;  %216 = vadd.xlane.f32.xlu1 %v194_v3  ;;  %v933_v14 = vld [vmem:[%s897_s10 + $0x70] sm:$0xff]  ;;  %v936_v15 = vld [vmem:[%s897_s10 + $0x78] sm:$0xff]  ;;  %v941_v16 = vld [vmem:[%s897_s10 + $0x80] sm:$0xff]  ;;  %p710_p13 = pnand %p709_p11, %p1189_p12  ;;  %s712_s28 = sshll.u32 %s777_s27, 4  ;;  %s713_s28 = int_to_ptr.vmem [resolvable:$false] %s712_s28 }
  0x3b   : > { %v944_v17 = vld [vmem:[%s897_s10 + $0x88] sm:$0xff]  ;;  %v949_v18 = vld [vmem:[%s897_s10 + $0x90] sm:$0xff]  ;;  %s714_s29 = scalar_lea.vmem %s713_s28, 4864  ;;  %p715_p5 = scmp.lt.s32.totalorder %s1132_s17, %s713_s28 }
  0x3c   : > { %p711_p4 = pneg %p710_p13  ;;  %p716_p7 = scmp.lt.s32.totalorder %s714_s29, %s708_s26 }
  0x3e   : > { %218 = vadd.xlane.f32.xlu0 %v195_v4  ;;  %220 = vadd.xlane.f32.xlu1 %v196_v5  ;;  %p717_p8 = por %p716_p7, %p715_p5 }
  0x40   : > { %p718_p10 = pnand %p717_p8, %p711_p4 }
  0x42   : > { %222 = vadd.xlane.f32.xlu0 %v197_v6  ;;  %224 = vadd.xlane.f32.xlu1 %v198_v7 }
  0x46   : > { %226 = vadd.xlane.f32.xlu0 %v199_v8  ;;  %228 = vadd.xlane.f32.xlu1 %v913_v9 }
  0x4a   : > { %230 = vadd.xlane.f32.xlu0 %v917_v10  ;;  %232 = vadd.xlane.f32.xlu1 %v920_v11 }
  0x4e   : > { %234 = vadd.xlane.f32.xlu0 %v925_v12  ;;  %236 = vadd.xlane.f32.xlu1 %v928_v13 }
  0x52   : > { %238 = vadd.xlane.f32.xlu0 %v933_v14  ;;  %240 = vadd.xlane.f32.xlu1 %v936_v15 }
  0x56   : > { %242 = vadd.xlane.f32.xlu0 %v941_v16  ;;  %244 = vadd.xlane.f32.xlu1 %v944_v17 }
  0x5a   : > { %246 = vadd.xlane.f32.xlu0 %v949_v18 }
  0xbf   : > { %v211_v19 = vpop.xlane.xlu0 %210  ;;  %v215_v20 = vpop.xlane.xlu1 %214 }
  0xc0   : > { %v249_v21 = vmul.f32 0.0078125, %v211_v19  ;;  %v251_v22 = vmul.f32 0.0078125, %v215_v20 }
  0xc2   : > { %v952_v23 = vsub.f32 %v191_v0, %v249_v21  ;;  %v954_v24 = vsub.f32 %v193_v1, %v251_v22 }
  0xc3   : > { %v213_v25 = vpop.xlane.xlu0 %212  ;;  %v217_v26 = vpop.xlane.xlu1 %216 }
  0xc4   : > { %v250_v27 = vmul.f32 0.0078125, %v213_v25  ;;  %v287_v28 = vmul.f32 %v952_v23, %v952_v23  ;;  %v252_v29 = vmul.f32 0.0078125, %v217_v26  ;;  %v289_v32 = vmul.f32 %v954_v24, %v954_v24 }
  0xc6   : > { %v958_v30 = vsub.f32 %v192_v2, %v250_v27  ;;  %306 = vadd.xlane.f32.xlu1 %v287_v28  ;;  %v960_v31 = vsub.f32 %v194_v3, %v252_v29 }
  0xc7   : > { %v219_v33 = vpop.xlane.xlu0 %218  ;;  %v221_v34 = vpop.xlane.xlu1 %220 }
  0xc8   : > { %v253_v35 = vmul.f32 0.0078125, %v219_v33  ;;  %v288_v36 = vmul.f32 %v958_v30, %v958_v30  ;;  %v254_v37 = vmul.f32 0.0078125, %v221_v34  ;;  %v290_v40 = vmul.f32 %v960_v31, %v960_v31 }
  0xca   : > { %v966_v38 = vsub.f32 %v195_v4, %v253_v35  ;;  %310 = vadd.xlane.f32.xlu1 %v289_v32  ;;  %308 = vadd.xlane.f32.xlu0 %v288_v36  ;;  %v968_v39 = vsub.f32 %v196_v5, %v254_v37 }
  0xcb   : > { %v223_v41 = vpop.xlane.xlu0 %222  ;;  %v225_v42 = vpop.xlane.xlu1 %224 }
  0xcc   : > { %v255_v43 = vmul.f32 0.0078125, %v223_v41  ;;  %v291_v44 = vmul.f32 %v966_v38, %v966_v38  ;;  %v256_v45 = vmul.f32 0.0078125, %v225_v42  ;;  %v292_v48 = vmul.f32 %v968_v39, %v968_v39 }
  0xce   : > { %v974_v46 = vsub.f32 %v197_v6, %v255_v43  ;;  %312 = vadd.xlane.f32.xlu0 %v290_v40  ;;  %314 = vadd.xlane.f32.xlu1 %v291_v44  ;;  %v976_v47 = vsub.f32 %v198_v7, %v256_v45 }
  0xcf   : > { %v227_v49 = vpop.xlane.xlu0 %226  ;;  %v229_v50 = vpop.xlane.xlu1 %228 }
  0xd0   : > { %v257_v51 = vmul.f32 0.0078125, %v227_v49  ;;  %v293_v52 = vmul.f32 %v974_v46, %v974_v46  ;;  %v258_v53 = vmul.f32 0.0078125, %v229_v50  ;;  %v294_v56 = vmul.f32 %v976_v47, %v976_v47 }
  0xd2   : > { %v982_v54 = vsub.f32 %v199_v8, %v257_v51  ;;  %316 = vadd.xlane.f32.xlu0 %v292_v48  ;;  %318 = vadd.xlane.f32.xlu1 %v293_v52  ;;  %v985_v55 = vsub.f32 %v913_v9, %v258_v53 }
  0xd3   : > { %v231_v57 = vpop.xlane.xlu0 %230  ;;  %v233_v58 = vpop.xlane.xlu1 %232 }
  0xd4   : > { %v259_v59 = vmul.f32 0.0078125, %v231_v57  ;;  %v295_v60 = vmul.f32 %v982_v54, %v982_v54  ;;  %v260_v61 = vmul.f32 0.0078125, %v233_v58  ;;  %v296_v0 = vmul.f32 %v985_v55, %v985_v55 }
  0xd6   : > { %v992_v62 = vsub.f32 %v917_v10, %v259_v59  ;;  %320 = vadd.xlane.f32.xlu0 %v294_v56  ;;  %322 = vadd.xlane.f32.xlu1 %v295_v60  ;;  %v995_v63 = vsub.f32 %v920_v11, %v260_v61 }
  0xd7   : > { %v235_v1 = vpop.xlane.xlu0 %234  ;;  %v237_v2 = vpop.xlane.xlu1 %236 }
  0xd8   : > { %v261_v3 = vmul.f32 0.0078125, %v235_v1  ;;  %v297_v4 = vmul.f32 %v992_v62, %v992_v62  ;;  %v262_v5 = vmul.f32 0.0078125, %v237_v2  ;;  %v298_v8 = vmul.f32 %v995_v63, %v995_v63 }
  0xda   : > { %v1002_v6 = vsub.f32 %v925_v12, %v261_v3  ;;  %324 = vadd.xlane.f32.xlu0 %v296_v0  ;;  %326 = vadd.xlane.f32.xlu1 %v297_v4  ;;  %v1005_v7 = vsub.f32 %v928_v13, %v262_v5  ;;  %v1041_v5 = vld [vmem:[%s1179_s1] ss:$0 sm:$0xff] }
  0xdb   : > { %v239_v9 = vpop.xlane.xlu0 %238  ;;  %v241_v10 = vpop.xlane.xlu1 %240 }
  0xdc   : > { %v263_v11 = vmul.f32 0.0078125, %v239_v9  ;;  %v299_v19 = vmul.f32 %v1002_v6, %v1002_v6  ;;  %v264_v20 = vmul.f32 0.0078125, %v241_v10  ;;  %v300_v13 = vmul.f32 %v1005_v7, %v1005_v7 }
  0xde   : > { %v1012_v21 = vsub.f32 %v933_v14, %v263_v11  ;;  %328 = vadd.xlane.f32.xlu0 %v298_v8  ;;  %330 = vadd.xlane.f32.xlu1 %v299_v19  ;;  %v1015_v12 = vsub.f32 %v936_v15, %v264_v20  ;;  %v1047_v11 = vld [vmem:[%s1180_s2] ss:$0 sm:$0xff] }
  0xdf   : > { %v243_v22 = vpop.xlane.xlu0 %242  ;;  %v245_v25 = vpop.xlane.xlu1 %244 }
  0xe0   : > { %v265_v26 = vmul.f32 0.0078125, %v243_v22  ;;  %v301_v27 = vmul.f32 %v1012_v21, %v1012_v21  ;;  %v266_v28 = vmul.f32 0.0078125, %v245_v25  ;;  %v302_v15 = vmul.f32 %v1015_v12, %v1015_v12 }
  0xe2   : > { %v1022_v29 = vsub.f32 %v941_v16, %v265_v26  ;;  %332 = vadd.xlane.f32.xlu0 %v300_v13  ;;  %334 = vadd.xlane.f32.xlu1 %v301_v27  ;;  %v1025_v14 = vsub.f32 %v944_v17, %v266_v28 }
  0xe3   : > { %v247_v32 = vpop.xlane.xlu0 %246 }
  0xe4   : > { %v267_v33 = vmul.f32 0.0078125, %v247_v32  ;;  %v303_v34 = vmul.f32 %v1022_v29, %v1022_v29  ;;  %v304_v16 = vmul.f32 %v1025_v14, %v1025_v14 }
  0xe6   : > { %v1032_v35 = vsub.f32 %v949_v18, %v267_v33  ;;  %336 = vadd.xlane.f32.xlu0 %v302_v15  ;;  %338 = vadd.xlane.f32.xlu1 %v303_v34 }
  0xe8   : > { %v305_v17 = vmul.f32 %v1032_v35, %v1032_v35 }
  0xea   : > { %340 = vadd.xlane.f32.xlu0 %v304_v16  ;;  %342 = vadd.xlane.f32.xlu1 %v305_v17 }
 0x14f   : > { %v307_v36 = vpop.xlane.xlu1 %306 }
 0x150   : > { %v344_v37 = vmul.f32 0.0078125, %v307_v36 }
 0x152   : > { %v363_v40 = vadd.f32 1e-05, %v344_v37 }
 0x153   : > { %v311_v41 = vpop.xlane.xlu1 %310  ;;  %v309_v42 = vpop.xlane.xlu0 %308 }
 0x154   : > { %642 = vrsqrt.f32 %v363_v40  ;;  %v346_v43 = vmul.f32 0.0078125, %v311_v41  ;;  %v345_v44 = vmul.f32 0.0078125, %v309_v42 }
 0x156   : > { %v365_v18 = vadd.f32 1e-05, %v346_v43  ;;  %v364_v45 = vadd.f32 1e-05, %v345_v44 }
 0x157   : > { %v315_v48 = vpop.xlane.xlu1 %314  ;;  %v313_v49 = vpop.xlane.xlu0 %312 }
 0x158   : > { %644 = vrsqrt.f32 %v365_v18  ;;  %v348_v50 = vmul.f32 0.0078125, %v315_v48  ;;  %v347_v51 = vmul.f32 0.0078125, %v313_v49 }
 0x159   : > { %646 = vrsqrt.f32 %v364_v45 }
 0x15a   : > { %v367_v52 = vadd.f32 1e-05, %v348_v50  ;;  %v366_v53 = vadd.f32 1e-05, %v347_v51 }
 0x15b   : > { %v319_v56 = vpop.xlane.xlu1 %318  ;;  %v317_v57 = vpop.xlane.xlu0 %316 }
 0x15c   : > { %648 = vrsqrt.f32 %v367_v52  ;;  %v350_v58 = vmul.f32 0.0078125, %v319_v56  ;;  %v349_v59 = vmul.f32 0.0078125, %v317_v57 }
 0x15d   : > { %650 = vrsqrt.f32 %v366_v53 }
 0x15e   : > { %v369_v60 = vadd.f32 1e-05, %v350_v58  ;;  %v368_v61 = vadd.f32 1e-05, %v349_v59 }
 0x15f   : > { %v323_v0 = vpop.xlane.xlu1 %322  ;;  %v321_v1 = vpop.xlane.xlu0 %320 }
 0x160   : > { %652 = vrsqrt.f32 %v369_v60  ;;  %v352_v2 = vmul.f32 0.0078125, %v323_v0  ;;  %v351_v3 = vmul.f32 0.0078125, %v321_v1 }
 0x161   : > { %v643_v4 = vpop.eup %642  ;;  %654 = vrsqrt.f32 %v368_v61 }
 0x162   : > { %v401_v8 = vmul.f32 %v643_v4, %v952_v23  ;;  %v371_v9 = vadd.f32 1e-05, %v352_v2  ;;  %v370_v10 = vadd.f32 1e-05, %v351_v3 }
 0x163   : > { %v327_v19 = vpop.xlane.xlu1 %326  ;;  %v325_v20 = vpop.xlane.xlu0 %324 }
 0x164   : > { %v427_v13 = vmul.f32 %v1041_v5, %v401_v8  ;;  %656 = vrsqrt.f32 %v371_v9  ;;  %v354_v22 = vmul.f32 0.0078125, %v327_v19  ;;  %v353_v25 = vmul.f32 0.0078125, %v325_v20 }
 0x165   : > { %v645_v26 = vpop.eup %644  ;;  %658 = vrsqrt.f32 %v370_v10 }
 0x166   : > { %v647_v27 = vpop.eup %646  ;;  %v453_v23 = vadd.f32 %v1047_v11, %v427_v13  ;;  %v403_v28 = vmul.f32 %v645_v26, %v954_v24  ;;  %v373_v15 = vadd.f32 1e-05, %v354_v22  ;;  %v372_v32 = vadd.f32 1e-05, %v353_v25 }
 0x167   : > { %v402_v33 = vmul.f32 %v647_v27, %v958_v30  ;;  %v331_v34 = vpop.xlane.xlu1 %330  ;;  %v329_v16 = vpop.xlane.xlu0 %328 }
 0x168   : > { %472 = vst [vmem:[%s1055_s7] sm:$0xff] %v453_v23  ;;  %v429_v17 = vmul.f32 %v1041_v5, %v403_v28  ;;  %660 = vrsqrt.f32 %v373_v15  ;;  %v356_v36 = vmul.f32 0.0078125, %v331_v34  ;;  %v355_v37 = vmul.f32 0.0078125, %v329_v16 }
 0x169   : > { %v649_v40 = vpop.eup %648  ;;  %v428_v24 = vmul.f32 %v1041_v5, %v402_v33  ;;  %662 = vrsqrt.f32 %v372_v32 }
 0x16a   : > { %v651_v41 = vpop.eup %650  ;;  %v455_v30 = vadd.f32 %v1047_v11, %v429_v17  ;;  %v405_v42 = vmul.f32 %v649_v40, %v966_v38  ;;  %v375_v43 = vadd.f32 1e-05, %v356_v36  ;;  %v374_v44 = vadd.f32 1e-05, %v355_v37 }
 0x16b   : > { %v454_v18 = vadd.f32 %v1047_v11, %v428_v24  ;;  %v404_v45 = vmul.f32 %v651_v41, %v960_v31  ;;  %v335_v48 = vpop.xlane.xlu1 %334  ;;  %v333_v49 = vpop.xlane.xlu0 %332 }
 0x16c   : > { %474 = vst [vmem:[%s1055_s7 + $0x10] sm:$0xff] %v455_v30  ;;  %v431_v50 = vmul.f32 %v1041_v5, %v405_v42  ;;  %664 = vrsqrt.f32 %v375_v43  ;;  %v358_v51 = vmul.f32 0.0078125, %v335_v48  ;;  %v357_v52 = vmul.f32 0.0078125, %v333_v49 }
 0x16d   : > { %v653_v53 = vpop.eup %652  ;;  %473 = vst [vmem:[%s1055_s7 + $0x8] sm:$0xff] %v454_v18  ;;  %v430_v56 = vmul.f32 %v1041_v5, %v404_v45  ;;  %666 = vrsqrt.f32 %v374_v44 }
 0x16e   : > { %v655_v38 = vpop.eup %654  ;;  %v457_v57 = vadd.f32 %v1047_v11, %v431_v50  ;;  %v407_v31 = vmul.f32 %v653_v53, %v974_v46  ;;  %v377_v58 = vadd.f32 1e-05, %v358_v51  ;;  %v376_v59 = vadd.f32 1e-05, %v357_v52 }
 0x16f   : > { %v456_v60 = vadd.f32 %v1047_v11, %v430_v56  ;;  %v406_v61 = vmul.f32 %v655_v38, %v968_v39  ;;  %v339_v0 = vpop.xlane.xlu1 %338  ;;  %v337_v1 = vpop.xlane.xlu0 %336 }
 0x170   : > { %476 = vst [vmem:[%s1055_s7 + $0x20] sm:$0xff] %v457_v57  ;;  %v433_v2 = vmul.f32 %v1041_v5, %v407_v31  ;;  %668 = vrsqrt.f32 %v377_v58  ;;  %v360_v3 = vmul.f32 0.0078125, %v339_v0  ;;  %v359_v4 = vmul.f32 0.0078125, %v337_v1 }
 0x171   : > { %v657_v8 = vpop.eup %656  ;;  %475 = vst [vmem:[%s1055_s7 + $0x18] sm:$0xff] %v456_v60  ;;  %v432_v9 = vmul.f32 %v1041_v5, %v406_v61  ;;  %670 = vrsqrt.f32 %v376_v59 }
 0x172   : > { %v659_v46 = vpop.eup %658  ;;  %v459_v10 = vadd.f32 %v1047_v11, %v433_v2  ;;  %v409_v39 = vmul.f32 %v657_v8, %v982_v54  ;;  %v379_v19 = vadd.f32 1e-05, %v360_v3  ;;  %v378_v20 = vadd.f32 1e-05, %v359_v4 }
 0x173   : > { %v458_v13 = vadd.f32 %v1047_v11, %v432_v9  ;;  %v408_v22 = vmul.f32 %v659_v46, %v976_v47  ;;  %v343_v25 = vpop.xlane.xlu1 %342  ;;  %v341_v26 = vpop.xlane.xlu0 %340 }
 0x174   : > { %478 = vst [vmem:[%s1055_s7 + $0x30] sm:$0xff] %v459_v10  ;;  %v435_v27 = vmul.f32 %v1041_v5, %v409_v39  ;;  %672 = vrsqrt.f32 %v379_v19  ;;  %v362_v23 = vmul.f32 0.0078125, %v343_v25  ;;  %v361_v28 = vmul.f32 0.0078125, %v341_v26 }
 0x175   : > { %v661_v15 = vpop.eup %660  ;;  %477 = vst [vmem:[%s1055_s7 + $0x28] sm:$0xff] %v458_v13  ;;  %v434_v54 = vmul.f32 %v1041_v5, %v408_v22  ;;  %674 = vrsqrt.f32 %v378_v20 }
 0x176   : > { %v663_v32 = vpop.eup %662  ;;  %v461_v33 = vadd.f32 %v1047_v11, %v435_v27  ;;  %v411_v47 = vmul.f32 %v661_v15, %v992_v62  ;;  %v381_v34 = vadd.f32 1e-05, %v362_v23  ;;  %v380_v16 = vadd.f32 1e-05, %v361_v28 }
 0x177   : > { %v460_v17 = vadd.f32 %v1047_v11, %v434_v54  ;;  %v410_v36 = vmul.f32 %v663_v32, %v985_v55 }
 0x178   : > { %480 = vst [vmem:[%s1055_s7 + $0x40] sm:$0xff] %v461_v33  ;;  %v437_v37 = vmul.f32 %v1041_v5, %v411_v47  ;;  %676 = vrsqrt.f32 %v381_v34 }
 0x179   : > { %v665_v40 = vpop.eup %664  ;;  %479 = vst [vmem:[%s1055_s7 + $0x38] sm:$0xff] %v460_v17  ;;  %v436_v24 = vmul.f32 %v1041_v5, %v410_v36  ;;  %678 = vrsqrt.f32 %v380_v16 }
 0x17a   : > { %v667_v41 = vpop.eup %666  ;;  %v463_v62 = vadd.f32 %v1047_v11, %v437_v37  ;;  %v413_v30 = vmul.f32 %v665_v40, %v1002_v6 }
 0x17b   : > { %v462_v42 = vadd.f32 %v1047_v11, %v436_v24  ;;  %v412_v55 = vmul.f32 %v667_v41, %v995_v63 }
 0x17c   : > { %482 = vst [vmem:[%s1055_s7 + $0x50] sm:$0xff] %v463_v62  ;;  %v439_v43 = vmul.f32 %v1041_v5, %v413_v30 }
 0x17d   : > { %v669_v44 = vpop.eup %668  ;;  %481 = vst [vmem:[%s1055_s7 + $0x48] sm:$0xff] %v462_v42  ;;  %v438_v18 = vmul.f32 %v1041_v5, %v412_v55 }
 0x17e   : > { %v671_v45 = vpop.eup %670  ;;  %v465_v48 = vadd.f32 %v1047_v11, %v439_v43  ;;  %v415_v49 = vmul.f32 %v669_v44, %v1012_v21 }
 0x17f   : > { %v464_v6 = vadd.f32 %v1047_v11, %v438_v18  ;;  %v414_v50 = vmul.f32 %v671_v45, %v1005_v7 }
 0x180   : > { %484 = vst [vmem:[%s1055_s7 + $0x60] sm:$0xff] %v465_v48  ;;  %v441_v63 = vmul.f32 %v1041_v5, %v415_v49 }
 0x181   : > { %v673_v51 = vpop.eup %672  ;;  %483 = vst [vmem:[%s1055_s7 + $0x58] sm:$0xff] %v464_v6  ;;  %v440_v52 = vmul.f32 %v1041_v5, %v414_v50 }
 0x182   : > { %v675_v53 = vpop.eup %674  ;;  %v467_v56 = vadd.f32 %v1047_v11, %v441_v63  ;;  %v417_v21 = vmul.f32 %v673_v51, %v1022_v29 }
 0x183   : > { %v466_v38 = vadd.f32 %v1047_v11, %v440_v52  ;;  %v416_v7 = vmul.f32 %v675_v53, %v1015_v12 }
 0x184   : > { %486 = vst [vmem:[%s1055_s7 + $0x70] sm:$0xff] %v467_v56  ;;  %v443_v57 = vmul.f32 %v1041_v5, %v417_v21 }
 0x185   : > { %v677_v31 = vpop.eup %676  ;;  %485 = vst [vmem:[%s1055_s7 + $0x68] sm:$0xff] %v466_v38  ;;  %v442_v58 = vmul.f32 %v1041_v5, %v416_v7 }
 0x186   : > { %v679_v59 = vpop.eup %678  ;;  %v469_v60 = vadd.f32 %v1047_v11, %v443_v57  ;;  %v419_v29 = vmul.f32 %v677_v31, %v1032_v35 }
 0x187   : > { %v468_v61 = vadd.f32 %v1047_v11, %v442_v58  ;;  %v418_v12 = vmul.f32 %v679_v59, %v1025_v14 }
 0x188   : > { %488 = vst [vmem:[%s1055_s7 + $0x80] sm:$0xff] %v469_v60  ;;  %v445_v0 = vmul.f32 %v1041_v5, %v419_v29 }
 0x189   : > { %487 = vst [vmem:[%s1055_s7 + $0x78] sm:$0xff] %v468_v61  ;;  %v444_v1 = vmul.f32 %v1041_v5, %v418_v12 }
 0x18a   : > { %v471_v2 = vadd.f32 %v1047_v11, %v445_v0 }
 0x18b   : > { %v470_v14 = vadd.f32 %v1047_v11, %v444_v1 }
 0x18c   : > { %490 = vst [vmem:[%s1055_s7 + $0x90] sm:$0xff] %v471_v2 }
 0x18d   : > { %489 = vst [vmem:[%s1055_s7 + $0x88] sm:$0xff] %v470_v14 }
 0x18e   : > { %721 = shalt.err (!%p718_p10)
}
 0x18f   : > { %s722_s8 = scalar_lea.hbm %s1130_s25, 2432  ;;  %s726_s22 = scalar_lea.hbm %s1181_s3, 4864 }
 0x190   : > { %p723_p0 = scmp.ne.s32.totalorder %s1130_s25, %s722_s8  ;;  %p727_p1 = scmp.lt.s32.totalorder %s1130_s25, %s1181_s3 }
 0x191   : > { %p728_p3 = scmp.lt.s32.totalorder %s726_s22, %s722_s8 }
 0x192   : > { %p724_p2 = pnand %p723_p0, %p1189_p12 }
 0x193   : > { %p729_p6 = por %p728_p3, %p727_p1 }
 0x194   : > { %p725_p9 = pneg %p724_p2 }
 0x196   : > { %p730_p11 = pnand %p729_p6, %p725_p9 }
 0x198   : > { %733 = shalt.err (!%p730_p11)
}
 0x199   : > { %s778_s6 = smov 128   ;;  %s779_s7 = smov 8  }
 0x19a   : > { %594 = dma.vmem_to_hbm [thread:$0]  (%p1189_p12), %s1132_s17, 2432, %s1130_s25, %s492_s16, %s778_s6, %s778_s6, %s779_s7  }
 0x19b PF: > { %s520_s11 = sand.u32 1, %s760_s12   ;;  %p1190_p13 = scmp.ne.s32.totalorder %s1186_s24, 0 }
 0x19c   : > { %p1191_p4 = scmp.ge.s32.totalorder %s772_s15, 2  ;;  %s521_s19 = scalar_lea.sflag [#allocation4], %s520_s11 }
 0x19e   : > { %p601_p5 = pnand %p1191_p4, %p1190_p13 }
 0x1a0   : > { %p602_p7 = pneg %p601_p5 }
 0x1a2   : > { %755 = dma.done.wait (%p602_p7), %s521_s19, 2432  }
 0x1a3   : > { %757 = vsyncadd (%p602_p7), %s521_s19, 4294964864  ;;  %p16_p8 = scmp.ge.s32.totalorder %s825_s18, 4   ;;  %s1192_s12 = smov %s764_s13 }
 0x1a4   : > { %s1193_s13 = smov %s768_s14  ;;  %s1194_s14 = smov %s837_s21 }
 0x1a5   : > { %s1195_s15 = smov %s825_s18  ;;  %18 = sbr.rel (!%p16_p8) target bundleno = 5 (0x5), region = 77 }
 0x1aa   :  { %526 = vsyncpa [#allocation3], 1 }
 0x1ab   :  { %528 = vsyncpa [#allocation3 + $0x1], 1 }
 0x1ac   :  { %529 = vsyncpa [#allocation4], 1 }
 0x1ad   :  { %531 = vsyncpa [#allocation4 + $0x1], 1 }

</bundles_post_ra>
